<compile_context>
chip_gen: v6e
topology: v6e:2x2x1
jax: 0.10.0
libtpu: 0.0.40
codegen_flags: <defaults>
</compile_context>

<pallas_src>
import jax
import jax.numpy as jnp
from jax.experimental import pallas as pl
from jax.experimental.pallas import tpu as pltpu

LANE = 128      # lane width: feature dims padded to multiples of this
ROW = 16        # bf16 packs 2 rows per sublane -> batch tiles in multiples of 16
MAX_TB = 2048   # diminishing roofline returns past ~2048 rows per grid step


def _round_up(x, m):
    return (x + m - 1) // m * m


# ---------------------------------------------------------------------------
# Kernel: one batch tile through the whole MLP. Weights are VMEM-resident.
# ---------------------------------------------------------------------------
def mlp_kernel(x_ref, w1_ref, b1_ref, w2_ref, b2_ref, wdn_ref, bd_ref,
               s_ref, xr_ref):
    x = x_ref[...]                                            # (TB, Mp) bf16

    # encoder layer 1: Linear(M, h) + ReLU  (bf16 MXU inputs, f32 accumulate)
    h1 = jnp.dot(x, w1_ref[...], preferred_element_type=jnp.float32)
    h1 = jnp.maximum(h1 + b1_ref[...], 0.0)                   # (TB, hp) f32

    # encoder layer 2: Linear(h, N) + ReLU
    s = jnp.dot(h1.astype(jnp.bfloat16), w2_ref[...],
                preferred_element_type=jnp.float32)
    s = jnp.maximum(s + b2_ref[...], 0.0)                     # (TB, Np) f32

    # decoder: Linear(N, M); weight already column-normalized in prepare_params
    xr = jnp.dot(s.astype(jnp.bfloat16), wdn_ref[...],
                 preferred_element_type=jnp.float32) + bd_ref[...]

    # bf16 stores: halves the dominant per-step HBM write traffic
    s_ref[...] = s.astype(s_ref.dtype)
    xr_ref[...] = xr.astype(xr_ref.dtype)


# ---------------------------------------------------------------------------
# One-time parameter preparation (layout change, padding, bf16 cast, norm_D).
# ---------------------------------------------------------------------------
def prepare_params(w1, b1, w2, b2, wd, bd):
    """PyTorch layout in: w1:(h,M) b1:(h,) w2:(N,h) b2:(N,) wd:(M,N) bd:(M,).
    Returns (in, out)-layout bf16 weights padded to 128-multiples, f32 biases
    as (1, out) rows, plus (original, padded) dims.  The decoder weight is
    column-normalized here (norm_D=True forward semantics) since it depends
    only on the weight, not the batch tile."""
    # TODO(synk): on v7x, optionally cast weights to fp8 (native MXU support)
    # to halve resident-weight VMEM if accuracy allows.
    h, M = w1.shape
    N = w2.shape[0]
    Mp, hp, Np = _round_up(M, LANE), _round_up(h, LANE), _round_up(N, LANE)

    def pad2(a, r, c):
        return jnp.pad(a, ((0, r - a.shape[0]), (0, c - a.shape[1])))

    # PyTorch: w / (w.norm(dim=0, keepdim=True) + 1e-12), done in f32
    wd_n = wd / (jnp.sqrt(jnp.sum(wd * wd, axis=0, keepdims=True)) + 1e-12)

    w1_p = pad2(w1.T, Mp, hp).astype(jnp.bfloat16)       # (Mp, hp)
    w2_p = pad2(w2.T, hp, Np).astype(jnp.bfloat16)       # (hp, Np)
    wdn_p = pad2(wd_n.T, Np, Mp).astype(jnp.bfloat16)    # (Np, Mp)
    b1_p = jnp.pad(b1, (0, hp - h)).reshape(1, hp).astype(jnp.float32)
    b2_p = jnp.pad(b2, (0, Np - N)).reshape(1, Np).astype(jnp.float32)
    bd_p = jnp.pad(bd, (0, Mp - M)).reshape(1, Mp).astype(jnp.float32)

    return (w1_p, b1_p, w2_p, b2_p, wdn_p, bd_p), (M, N, h, Mp, Np, hp)


# ---------------------------------------------------------------------------
# VMEM budget / tile-size selection (generation-aware).
# ---------------------------------------------------------------------------
def _vmem_budget_bytes():
    """~80% of physical per-core VMEM, capped at 100 MiB.
    v7x (64 MiB)  -> ~51 MiB (headroom for compiler scratch/semaphores).
    v5e/v6e (128) -> 100 MiB (well above the small default scoped limit)."""
    try:
        info = pltpu.get_tpu_info()
        cap = int(getattr(info, "vmem_capacity_bytes", 64 * 1024 * 1024))
    except Exception:
        cap = 64 * 1024 * 1024          # conservative (v7x-sized) fallback
    return min(int(cap * 0.80), 100 * 1024 * 1024)


def _resident_spec(shape):
    """Constant-index weight/bias block; single-buffered when supported."""
    idx = lambda i: (0,) * len(shape)
    if hasattr(pl, "Buffered"):
        try:
            return pl.BlockSpec(shape, idx, pipeline_mode=pl.Buffered(1))
        except TypeError:
            pass
    return pl.BlockSpec(shape, idx)


def _choose_tb(B, Mp, Np, hp, budget, weights_single_buffered):
    """Largest batch tile that fits the VMEM budget (capped at MAX_TB), with a
    >=2-tile split when the whole batch fits so both TCs on v7x get work."""
    # Resident weight + bias footprint (bf16 weights, f32 bias rows).
    wbytes = 2 * (Mp * hp + hp * Np + Np * Mp) + 4 * (hp + Np + Mp)
    if not weights_single_buffered:
        wbytes *= 2
    # Per-row bytes: double-buffered bf16 x / s / xr blocks + f32 intermediates
    # (h1, s, xr) + bf16 casts of h1, s feeding the MXU.
    per_row = (4 * Mp) + (4 * Np) + (4 * Mp) \
              + (4 * hp + 4 * Np + 4 * Mp) + (2 * hp + 2 * Np)
    avail = budget - wbytes - (1 << 20)           # 1 MiB slack
    if avail < per_row * ROW:
        # TODO(synk): add a K/N-tiled fallback (grid over hp/Np with an f32
        # accumulator in scratch) for layer sizes whose weights exceed VMEM.
        raise ValueError("MLP weights exceed the VMEM budget; a K/N-tiled "
                         "fallback path is required for these dims.")
    row_cap = max(ROW, min((avail // per_row) // ROW * ROW, MAX_TB))

    b16 = _round_up(B, ROW)
    if b16 <= row_cap:
        if b16 >= 2 * ROW:
            half = _round_up((b16 + 1) // 2, ROW)   # >=2 tiles for dual-TC v7x
            return min(max(half, ROW), row_cap)
        return b16
    return row_cap


# ---------------------------------------------------------------------------
# Forward: pad batch, run the gridded kernel, (optionally) slice results back.
# ---------------------------------------------------------------------------
def mlp_forward(x, prepared, *, return_padded=False):
    (w1_p, b1_p, w2_p, b2_p, wdn_p, bd_p), (M, N, h, Mp, Np, hp) = prepared
    B = x.shape[0]

    budget = _vmem_budget_bytes()
    single_buf = hasattr(pl, "Buffered")
    TB = _choose_tb(B, Mp, Np, hp, budget, single_buf)
    B_pad = _round_up(B, TB)

    x_p = jnp.pad(x, ((0, B_pad - B), (0, Mp - M))).astype(jnp.bfloat16)

    grid = (B_pad // TB,)
    s_p, xr_p = pl.pallas_call(
        mlp_kernel,
        out_shape=(
            jax.ShapeDtypeStruct((B_pad, Np), jnp.bfloat16),   # S_
            jax.ShapeDtypeStruct((B_pad, Mp), jnp.bfloat16),   # X_
        ),
        grid=grid,
        in_specs=[
            pl.BlockSpec((TB, Mp), lambda i: (i, 0)),   # x tile (double-buffered)
            _resident_spec((Mp, hp)),                   # w1   (VMEM-resident)
            _resident_spec((1, hp)),                    # b1
            _resident_spec((hp, Np)),                   # w2
            _resident_spec((1, Np)),                    # b2
            _resident_spec((Np, Mp)),                   # wd_n^T
            _resident_spec((1, Mp)),                    # bd
        ],
        out_specs=(
            pl.BlockSpec((TB, Np), lambda i: (i, 0)),
            pl.BlockSpec((TB, Mp), lambda i: (i, 0)),
        ),
        compiler_params=pltpu.CompilerParams(
            dimension_semantics=("parallel",),
            vmem_limit_bytes=budget,
        ),
    )(x_p, w1_p, b1_p, w2_p, b2_p, wdn_p, bd_p)

    if return_padded:
        # Avoids an extra HBM read+write copy when M/N are not 128-multiples;
        # the consumer can slice (or keep) the padded buffers itself.
        return s_p, xr_p
    return s_p[:B, :N], xr_p[:B, :M]


# ---------------------------------------------------------------------------
# Deterministic init mimicking nn.Linear defaults + decoder normal(0, 0.02).
# ---------------------------------------------------------------------------
def init_params(M, N, h, key):
    ks = jax.random.split(key, 6)
    bm = 1.0 / (M ** 0.5)
    bh = 1.0 / (h ** 0.5)
    bn = 1.0 / (N ** 0.5)
    w1 = jax.random.uniform(ks[0], (h, M), jnp.float32, -bm, bm)
    b1 = jax.random.uniform(ks[1], (h,), jnp.float32, -bm, bm)
    w2 = jax.random.uniform(ks[2], (N, h), jnp.float32, -bh, bh)
    b2 = jax.random.uniform(ks[3], (N,), jnp.float32, -bh, bh)
    wd = 0.02 * jax.random.normal(ks[4], (M, N), jnp.float32)
    bd = jax.random.uniform(ks[5], (M,), jnp.float32, -bn, bn)
    return w1, b1, w2, b2, wd, bd


if __name__ == "__main__":
    B, M, N, h = 8, 16, 64, 32

    key = jax.random.PRNGKey(0)
    k_x, k_p = jax.random.split(key)
    x = jax.random.normal(k_x, (B, M), jnp.float32)
    w1, b1, w2, b2, wd, bd = init_params(M, N, h, k_p)

    prepared = prepare_params(w1, b1, w2, b2, wd, bd)
    s_, x_ = mlp_forward(x, prepared)
    jax.block_until_ready((s_, x_))

    # Reference matching the kernel's bf16-matmul / f32-accumulate numerics
    # (outputs compared against the kernel's bf16 stores with loose tolerance).
    bf = jnp.bfloat16
    h1_ref = jnp.maximum(
        jnp.dot(x.astype(bf), w1.T.astype(bf),
                preferred_element_type=jnp.float32) + b1, 0.0)
    s_ref = jnp.maximum(
        jnp.dot(h1_ref.astype(bf), w2.T.astype(bf),
                preferred_element_type=jnp.float32) + b2, 0.0)
    wd_n = wd / (jnp.linalg.norm(wd, axis=0, keepdims=True) + 1e-12)
    x_ref = jnp.dot(s_ref.astype(bf), wd_n.T.astype(bf),
                    preferred_element_type=jnp.float32) + bd

    assert jnp.allclose(s_.astype(jnp.float32), s_ref,
                        atol=3e-2, rtol=3e-2), "S_ mismatch"
    assert jnp.allclose(x_.astype(jnp.float32), x_ref,
                        atol=3e-2, rtol=3e-2), "X_ mismatch"

    print("KERNEL_OK")
</pallas_src>

<mosaic_0001>
module attributes {stable_mosaic.version = 11 : i64} {
  func.func @mlp_kernel(%arg0: i32, %arg1: memref<16x128xbf16, #tpu.memory_space<vmem>>, %arg2: memref<128x128xbf16, #tpu.memory_space<vmem>>, %arg3: memref<1x128xf32, #tpu.memory_space<vmem>>, %arg4: memref<128x128xbf16, #tpu.memory_space<vmem>>, %arg5: memref<1x128xf32, #tpu.memory_space<vmem>>, %arg6: memref<128x128xbf16, #tpu.memory_space<vmem>>, %arg7: memref<1x128xf32, #tpu.memory_space<vmem>>, %arg8: memref<16x128xbf16, #tpu.memory_space<vmem>>, %arg9: memref<16x128xbf16, #tpu.memory_space<vmem>>) attributes {dimension_semantics = [#tpu.dimension_semantics<parallel>], iteration_bounds = array<i64: 1>, scalar_prefetch = 0 : i64, scratch_operands = 0 : i64, tpu.core_type = #tpu.core_type<tc>, window_params = [{transform_indices = @transform_0, window_bounds = array<i64: 16, 128>}, {pipeline_mode = #tpu.pipeline_mode<synchronous>, transform_indices = @transform_1, window_bounds = array<i64: 128, 128>}, {pipeline_mode = #tpu.pipeline_mode<synchronous>, transform_indices = @transform_2, window_bounds = array<i64: 1, 128>}, {pipeline_mode = #tpu.pipeline_mode<synchronous>, transform_indices = @transform_3, window_bounds = array<i64: 128, 128>}, {pipeline_mode = #tpu.pipeline_mode<synchronous>, transform_indices = @transform_4, window_bounds = array<i64: 1, 128>}, {pipeline_mode = #tpu.pipeline_mode<synchronous>, transform_indices = @transform_5, window_bounds = array<i64: 128, 128>}, {pipeline_mode = #tpu.pipeline_mode<synchronous>, transform_indices = @transform_6, window_bounds = array<i64: 1, 128>}, {transform_indices = @transform_7, window_bounds = array<i64: 16, 128>}, {transform_indices = @transform_8, window_bounds = array<i64: 16, 128>}]} {
    %c0 = arith.constant 0 : index
    %c0_0 = arith.constant 0 : index
    %0 = vector.load %arg1[%c0, %c0_0] : memref<16x128xbf16, #tpu.memory_space<vmem>>, vector<16x128xbf16>
    %c0_1 = arith.constant 0 : index
    %c0_2 = arith.constant 0 : index
    %1 = vector.load %arg2[%c0_1, %c0_2] : memref<128x128xbf16, #tpu.memory_space<vmem>>, vector<128x128xbf16>
    %cst = arith.constant dense<0.000000e+00> : vector<16x128xf32>
    %2 = tpu.matmul %0, %1, %cst {dimension_numbers = #tpu.dot_dimension_numbers<[1], [0], [0], [1], [0, 0, 1, 1], [], []>} : vector<16x128xbf16>, vector<128x128xbf16>, vector<16x128xf32> -> vector<16x128xf32>
    %c0_3 = arith.constant 0 : index
    %c0_4 = arith.constant 0 : index
    %3 = vector.load %arg3[%c0_3, %c0_4] : memref<1x128xf32, #tpu.memory_space<vmem>>, vector<1x128xf32>
    %4 = vector.broadcast %3 : vector<1x128xf32> to vector<16x128xf32>
    %5 = arith.addf %2, %4 : vector<16x128xf32>
    %cst_5 = arith.constant 0.000000e+00 : f32
    %6 = vector.broadcast %cst_5 : f32 to vector<16x128xf32>
    %7 = arith.maximumf %5, %6 : vector<16x128xf32>
    %8 = arith.truncf %7 : vector<16x128xf32> to vector<16x128xbf16>
    %c0_6 = arith.constant 0 : index
    %c0_7 = arith.constant 0 : index
    %9 = vector.load %arg4[%c0_6, %c0_7] : memref<128x128xbf16, #tpu.memory_space<vmem>>, vector<128x128xbf16>
    %cst_8 = arith.constant dense<0.000000e+00> : vector<16x128xf32>
    %10 = tpu.matmul %8, %9, %cst_8 {dimension_numbers = #tpu.dot_dimension_numbers<[1], [0], [0], [1], [0, 0, 1, 1], [], []>} : vector<16x128xbf16>, vector<128x128xbf16>, vector<16x128xf32> -> vector<16x128xf32>
    %c0_9 = arith.constant 0 : index
    %c0_10 = arith.constant 0 : index
    %11 = vector.load %arg5[%c0_9, %c0_10] : memref<1x128xf32, #tpu.memory_space<vmem>>, vector<1x128xf32>
    %12 = vector.broadcast %11 : vector<1x128xf32> to vector<16x128xf32>
    %13 = arith.addf %10, %12 : vector<16x128xf32>
    %cst_11 = arith.constant 0.000000e+00 : f32
    %14 = vector.broadcast %cst_11 : f32 to vector<16x128xf32>
    %15 = arith.maximumf %13, %14 : vector<16x128xf32>
    %16 = arith.truncf %15 : vector<16x128xf32> to vector<16x128xbf16>
    %c0_12 = arith.constant 0 : index
    %c0_13 = arith.constant 0 : index
    %17 = vector.load %arg6[%c0_12, %c0_13] : memref<128x128xbf16, #tpu.memory_space<vmem>>, vector<128x128xbf16>
    %cst_14 = arith.constant dense<0.000000e+00> : vector<16x128xf32>
    %18 = tpu.matmul %16, %17, %cst_14 {dimension_numbers = #tpu.dot_dimension_numbers<[1], [0], [0], [1], [0, 0, 1, 1], [], []>} : vector<16x128xbf16>, vector<128x128xbf16>, vector<16x128xf32> -> vector<16x128xf32>
    %c0_15 = arith.constant 0 : index
    %c0_16 = arith.constant 0 : index
    %19 = vector.load %arg7[%c0_15, %c0_16] : memref<1x128xf32, #tpu.memory_space<vmem>>, vector<1x128xf32>
    %20 = vector.broadcast %19 : vector<1x128xf32> to vector<16x128xf32>
    %21 = arith.addf %18, %20 : vector<16x128xf32>
    %22 = arith.truncf %15 : vector<16x128xf32> to vector<16x128xbf16>
    %c0_17 = arith.constant 0 : index
    %c0_18 = arith.constant 0 : index
    %23 = vector.load %arg8[%c0_17, %c0_18] : memref<16x128xbf16, #tpu.memory_space<vmem>>, vector<16x128xbf16>
    tpu.vector_store %arg8[%c0_17, %c0_18], %22 {strides = array<i32>} : memref<16x128xbf16, #tpu.memory_space<vmem>>, vector<16x128xbf16>,
    %24 = arith.truncf %21 : vector<16x128xf32> to vector<16x128xbf16>
    %c0_19 = arith.constant 0 : index
    %c0_20 = arith.constant 0 : index
    %25 = vector.load %arg9[%c0_19, %c0_20] : memref<16x128xbf16, #tpu.memory_space<vmem>>, vector<16x128xbf16>
    tpu.vector_store %arg9[%c0_19, %c0_20], %24 {strides = array<i32>} : memref<16x128xbf16, #tpu.memory_space<vmem>>, vector<16x128xbf16>,
    return
  }
  func.func @transform_0(%arg0: i32) -> (i32, i32) {
    %c0_i32 = arith.constant 0 : i32
    %c0_i32_0 = arith.constant 0 : i32
    return %arg0, %c0_i32 : i32, i32
  }
  func.func @transform_1(%arg0: i32) -> (i32, i32) {
    %c0_i32 = arith.constant 0 : i32
    %c0_i32_0 = arith.constant 0 : i32
    %c0_i32_1 = arith.constant 0 : i32
    return %c0_i32, %c0_i32_0 : i32, i32
  }
  func.func @transform_2(%arg0: i32) -> (i32, i32) {
    %c0_i32 = arith.constant 0 : i32
    %c0_i32_0 = arith.constant 0 : i32
    %c0_i32_1 = arith.constant 0 : i32
    return %c0_i32, %c0_i32_0 : i32, i32
  }
  func.func @transform_3(%arg0: i32) -> (i32, i32) {
    %c0_i32 = arith.constant 0 : i32
    %c0_i32_0 = arith.constant 0 : i32
    %c0_i32_1 = arith.constant 0 : i32
    return %c0_i32, %c0_i32_0 : i32, i32
  }
  func.func @transform_4(%arg0: i32) -> (i32, i32) {
    %c0_i32 = arith.constant 0 : i32
    %c0_i32_0 = arith.constant 0 : i32
    %c0_i32_1 = arith.constant 0 : i32
    return %c0_i32, %c0_i32_0 : i32, i32
  }
  func.func @transform_5(%arg0: i32) -> (i32, i32) {
    %c0_i32 = arith.constant 0 : i32
    %c0_i32_0 = arith.constant 0 : i32
    %c0_i32_1 = arith.constant 0 : i32
    return %c0_i32, %c0_i32_0 : i32, i32
  }
  func.func @transform_6(%arg0: i32) -> (i32, i32) {
    %c0_i32 = arith.constant 0 : i32
    %c0_i32_0 = arith.constant 0 : i32
    %c0_i32_1 = arith.constant 0 : i32
    return %c0_i32, %c0_i32_0 : i32, i32
  }
  func.func @transform_7(%arg0: i32) -> (i32, i32) {
    %c0_i32 = arith.constant 0 : i32
    %c0_i32_0 = arith.constant 0 : i32
    return %arg0, %c0_i32 : i32, i32
  }
  func.func @transform_8(%arg0: i32) -> (i32, i32) {
    %c0_i32 = arith.constant 0 : i32
    %c0_i32_0 = arith.constant 0 : i32
    return %arg0, %c0_i32 : i32, i32
  }
}

</mosaic_0001>

<bundles_post_ra>
// kernel: tpu_custom_call.1
= control target key start
LH: loop header
LB: loop body
LE: loop exit
PB: predicated region body
PF: predicated region fallthrough
CT: control target
= control target key end

     0   :  { %14 = vsyncpa [#allocation3], 0  ;;  %s918_s0 = inlined_call_operand.hbm [shape: bf16[16,128], index: 0, kind: input, shape index: {}]   ;;  %s919_s1 = inlined_call_operand.hbm [shape: bf16[128,128], index: 1, kind: input, shape index: {}]   ;;  %s920_s2 = inlined_call_operand.vmem [shape: f32[1,128], index: 2, kind: input, shape index: {}]   ;;  %s921_s3 = inlined_call_operand.hbm [shape: bf16[128,128], index: 3, kind: input, shape index: {}]   ;;  %s922_s4 = inlined_call_operand.vmem [shape: f32[1,128], index: 4, kind: input, shape index: {}]   ;;  %s923_s5 = inlined_call_operand.hbm [shape: bf16[128,128], index: 5, kind: input, shape index: {}]   ;;  %s924_s6 = inlined_call_operand.vmem [shape: f32[1,128], index: 6, kind: input, shape index: {}]   ;;  %s925_s7 = inlined_call_operand.hbm [shape: bf16[16,128], index: 7, kind: output, shape index: {0}]   ;;  %s926_s8 = inlined_call_operand.hbm [shape: bf16[16,128], index: 8, kind: output, shape index: {1}]  }
   0x1   :  { %15 = vsyncpa [#allocation6], 0 }
   0x2   :  { %16 = vsyncpa [#allocation9], 0 }
   0x3   :  { %17 = vsyncpa [#allocation4], 0 }
   0x4   :  { %18 = vsyncpa [#allocation12], 0  ;;  %s788_s27 = smov [#allocation5]   ;;  %s789_s29 = smov [#allocation2]  }
   0x5   :  { %s36_s28 = sshll.u32 %s788_s27, 4  ;;  %s24_s30 = sshll.u32 %s789_s29, 4  ;;  %s37_s28 = int_to_ptr.vmem [resolvable:$true] %s36_s28  ;;  %s25_s30 = int_to_ptr.vmem [resolvable:$true] %s24_s30 }
   0x6   :  { %s666_s9 = scalar_lea.vmem %s37_s28, 1024  ;;  %p671_p1 = scmp.lt.s32.totalorder %s37_s28, %s37_s28 }
   0x7   :  { %p667_p0 = scmp.ne.s32.totalorder %s37_s28, %s666_s9  ;;  %p672_p2 = scmp.lt.s32.totalorder %s666_s9, %s666_s9 }
   0x9   :  { %p673_p3 = por %p672_p2, %p671_p1 }
   0xb   :  { %p674_p4 = pnand %p673_p3, %p667_p0 }
   0xd   :  { %677 = shalt.err (!%p674_p4)
}
   0xe   :  { %s790_s10 = smov 64   ;;  %s791_s11 = smov 4  }
   0xf   :  { %42 = dma.hbm_to_vmem [thread:$0]  %s919_s1, 1024, %s37_s28, [#allocation6], %s790_s10, %s790_s10, %s791_s11  }
  0x10   :  { %s686_s14 = scalar_lea.vmem %s25_s30, 128  ;;  %p691_p6 = scmp.lt.s32.totalorder %s25_s30, %s25_s30 }
  0x11   :  { %p687_p5 = scmp.ne.s32.totalorder %s25_s30, %s686_s14  ;;  %p692_p7 = scmp.lt.s32.totalorder %s686_s14, %s686_s14 }
  0x13   :  { %p693_p8 = por %p692_p7, %p691_p6 }
  0x15   :  { %p694_p9 = pnand %p693_p8, %p687_p5 }
  0x17   :  { %697 = shalt.err (!%p694_p9)
}
  0x18   :  { %30 = dma.hbm_to_vmem [thread:$0]  %s918_s0, 128, %s25_s30, [#allocation3], %s790_s10, %s790_s10, %s791_s11  }
  0x19   :  { %s792_s17 = smov [#allocation7]   ;;  %s793_s19 = smov [#allocation8]  }
  0x1a   :  { %s50_s18 = sshll.u32 %s792_s17, 4  ;;  %s64_s20 = sshll.u32 %s793_s19, 4  ;;  %s51_s18 = int_to_ptr.vmem [resolvable:$true] %s50_s18  ;;  %s65_s20 = int_to_ptr.vmem [resolvable:$true] %s64_s20 }
  0x1b   :  { %s706_s1 = scalar_lea.vmem %s51_s18, 1024  ;;  %p711_p11 = scmp.lt.s32.totalorder %s51_s18, %s51_s18 }
  0x1c   :  { %p707_p10 = scmp.ne.s32.totalorder %s51_s18, %s706_s1  ;;  %p712_p12 = scmp.lt.s32.totalorder %s706_s1, %s706_s1 }
  0x1e   :  { %p713_p13 = por %p712_p12, %p711_p11 }
  0x20   :  { %p714_p0 = pnand %p713_p13, %p707_p10 }
  0x22   :  { %717 = shalt.err (!%p714_p0)
}
  0x23   :  { %56 = dma.hbm_to_vmem [thread:$0]  %s921_s3, 1024, %s51_s18, [#allocation6], %s790_s10, %s790_s10, %s791_s11  }
  0x24   :  { %s726_s0 = scalar_lea.vmem %s65_s20, 1024  ;;  %p731_p2 = scmp.lt.s32.totalorder %s65_s20, %s65_s20 }
  0x25   :  { %p727_p1 = scmp.ne.s32.totalorder %s65_s20, %s726_s0  ;;  %p732_p3 = scmp.lt.s32.totalorder %s726_s0, %s726_s0 }
  0x27   :  { %p733_p4 = por %p732_p3, %p731_p2 }
  0x29   :  { %p734_p5 = pnand %p733_p4, %p727_p1 }
  0x2b   :  { %737 = shalt.err (!%p734_p5)
}
  0x2c   :  { %70 = dma.hbm_to_vmem [thread:$0]  %s923_s5, 1024, %s65_s20, [#allocation9], %s790_s10, %s790_s10, %s791_s11  }
  0x2d   :  { %778 = dma.done.wait [#allocation3], 128  }
  0x2e   :  { %779 = vsyncadd [#allocation3], 4294967168 }
  0x2f   :  { %780 = dma.done.wait [#allocation6], 2048  }
  0x30   :  { %781 = vsyncadd [#allocation6], 4294965248 }
  0x31   :  { %782 = dma.done.wait [#allocation9], 1024  }
  0x32   :  { %783 = vsyncadd [#allocation9], 4294966272  ;;  %v794_v0 = vmov 0.0   ;;  %vm795_vm0 = vmmov 0   ;;  %v633_v1 = vld [vmem:[#allocation5 + $0x38] sm:$0xff]   ;;  %v634_v2 = vld [vmem:[#allocation5 + $0x30] sm:$0xff]  }
  0x33   :  { %563 = vmatprep.subr.bf16.mxu0 %v794_v0  ;;  %579 = vmatprep.mubr.msk.bf16.mxu0 %vm795_vm0, %v794_v0  ;;  %v635_v3 = vld [vmem:[#allocation5 + $0x28] sm:$0xff]   ;;  %v642_v4 = vld [vmem:[#allocation7 + $0x38] sm:$0xff]   ;;  %v636_v5 = vld [vmem:[#allocation5 + $0x20] sm:$0xff]   ;;  %s796_s26 = smov [#allocation10]  }
  0x34   :  { %583 = vmatprep.subr.bf16.mxu1 %v794_v0  ;;  %599 = vmatprep.mubr.msk.bf16.mxu1 %vm795_vm0, %v794_v0  ;;  %v643_v6 = vld [vmem:[#allocation7 + $0x30] sm:$0xff]   ;;  %v637_v7 = vld [vmem:[#allocation5 + $0x18] sm:$0xff]   ;;  %v644_v8 = vld [vmem:[#allocation7 + $0x28] sm:$0xff]   ;;  %s460_s27 = sshll.u32 %s796_s26, 4  ;;  %s461_s27 = int_to_ptr.vmem [resolvable:$true] %s460_s27 }
  0x35   :  { %564 = vmatpush3.bf16.msra.mxu0 %v633_v1  ;;  %584 = vmatpush3.bf16.msra.mxu1 %v642_v4  ;;  %v638_v9 = vld [vmem:[#allocation5 + $0x10] sm:$0xff]   ;;  %v645_v10 = vld [vmem:[#allocation7 + $0x20] sm:$0xff]   ;;  %v639_v11 = vld [vmem:[#allocation5 + $0x8] sm:$0xff]   ;;  %s738_s28 = scalar_lea.vmem %s461_s27, 128  ;;  %p743_p7 = scmp.lt.s32.totalorder %s461_s27, %s461_s27 }
  0x36   :  { %565 = vmatprep.subr.bf16.mxu0 %v794_v0  ;;  %585 = vmatprep.subr.bf16.mxu1 %v794_v0  ;;  %v646_v12 = vld [vmem:[#allocation7 + $0x18] sm:$0xff]   ;;  %v640_v13 = vld [vmem:[#allocation5] sm:$0xff]   ;;  %v647_v15 = vld [vmem:[#allocation7 + $0x10] sm:$0xff]   ;;  %p739_p6 = scmp.ne.s32.totalorder %s461_s27, %s738_s28  ;;  %p744_p8 = scmp.lt.s32.totalorder %s738_s28, %s738_s28 }
  0x37   :  { %v641_v14 = vld [vmem:[#allocation2] sm:$0xff]   ;;  %v648_v16 = vld [vmem:[#allocation7 + $0x8] sm:$0xff]   ;;  %v649_v17 = vld [vmem:[#allocation7] sm:$0xff]  }
  0x38   :  { %v650_v18 = vld [vmem:[#allocation8 + $0x38] sm:$0xff]   ;;  %v651_v19 = vld [vmem:[#allocation8 + $0x30] sm:$0xff]   ;;  %v652_v20 = vld [vmem:[#allocation8 + $0x28] sm:$0xff]   ;;  %p745_p9 = por %p744_p8, %p743_p7 }
  0x39   :  { %566 = vmatpush3.bf16.msra.mxu0 %v634_v2  ;;  %586 = vmatpush3.bf16.msra.mxu1 %v643_v6  ;;  %v653_v21 = vld [vmem:[#allocation8 + $0x20] sm:$0xff]   ;;  %v654_v22 = vld [vmem:[#allocation8 + $0x18] sm:$0xff]   ;;  %v655_v33 = vld [vmem:[#allocation8 + $0x10] sm:$0xff]  }
  0x3a   :  { %567 = vmatprep.subr.bf16.mxu0 %v794_v0  ;;  %587 = vmatprep.subr.bf16.mxu1 %v794_v0  ;;  %v490_v23 = vld [vmem:[%s920_s2] ss:$0 sm:$0xff]  ;;  %v656_v34 = vld [vmem:[#allocation8 + $0x8] sm:$0xff]   ;;  %v657_v35 = vld [vmem:[#allocation8] sm:$0xff]   ;;  %p746_p10 = pnand %p745_p9, %p739_p6 }
  0x3b   :  { %v500_v36 = vld [vmem:[%s922_s4] ss:$0 sm:$0xff] }
  0x3d   :  { %568 = vmatpush3.bf16.msra.mxu0 %v635_v3  ;;  %588 = vmatpush3.bf16.msra.mxu1 %v644_v8 }
  0x3e   :  { %569 = vmatprep.subr.bf16.mxu0 %v794_v0  ;;  %589 = vmatprep.subr.bf16.mxu1 %v794_v0 }
  0x41   :  { %570 = vmatpush3.bf16.msra.mxu0 %v636_v5  ;;  %590 = vmatpush3.bf16.msra.mxu1 %v645_v10 }
  0x42   :  { %571 = vmatprep.subr.bf16.mxu0 %v794_v0  ;;  %591 = vmatprep.subr.bf16.mxu1 %v794_v0 }
  0x45   :  { %572 = vmatpush3.bf16.msra.mxu0 %v637_v7  ;;  %592 = vmatpush3.bf16.msra.mxu1 %v646_v12 }
  0x46   :  { %573 = vmatprep.subr.bf16.mxu0 %v794_v0  ;;  %593 = vmatprep.subr.bf16.mxu1 %v794_v0 }
  0x49   :  { %574 = vmatpush3.bf16.msra.mxu0 %v638_v9  ;;  %594 = vmatpush3.bf16.msra.mxu1 %v647_v15 }
  0x4a   :  { %575 = vmatprep.subr.bf16.mxu0 %v794_v0  ;;  %595 = vmatprep.subr.bf16.mxu1 %v794_v0 }
  0x4d   :  { %576 = vmatpush3.bf16.msra.mxu0 %v639_v11  ;;  %596 = vmatpush3.bf16.msra.mxu1 %v648_v16 }
  0x4e   :  { %577 = vmatprep.subr.bf16.mxu0 %v794_v0  ;;  %597 = vmatprep.subr.bf16.mxu1 %v794_v0 }
  0x51   :  { %578 = vmatpush3.bf16.msra.mxu0 %v640_v13  ;;  %598 = vmatpush3.bf16.msra.mxu1 %v649_v17 }
  0x52   :  { %603 = vmatprep.subr.bf16.mxu0 %v794_v0 }
  0x54   :  { %580 = vmatmul.mubr.bf16.vlgmr.msra.gmra.mxu0 %v641_v14 }
  0x55   :  { %619 = vmatprep.mubr.msk.bf16.mxu0 %vm795_vm0, %v794_v0  ;;  %604 = vmatpush3.bf16.msra.mxu0 %v650_v18 }
  0x56   :  { %605 = vmatprep.subr.bf16.mxu0 %v794_v0 }
  0x59   :  { %606 = vmatpush3.bf16.msra.mxu0 %v651_v19 }
  0x5a   :  { %607 = vmatprep.subr.bf16.mxu0 %v794_v0 }
  0x5d   :  { %608 = vmatpush3.bf16.msra.mxu0 %v652_v20 }
  0x5e   :  { %609 = vmatprep.subr.bf16.mxu0 %v794_v0 }
  0x61   :  { %610 = vmatpush3.bf16.msra.mxu0 %v653_v21 }
  0x62   :  { %611 = vmatprep.subr.bf16.mxu0 %v794_v0 }
  0x65   :  { %612 = vmatpush3.bf16.msra.mxu0 %v654_v22 }
  0x66   :  { %613 = vmatprep.subr.bf16.mxu0 %v794_v0 }
  0x69   :  { %614 = vmatpush3.bf16.msra.mxu0 %v655_v33 }
  0x6a   :  { %615 = vmatprep.subr.bf16.mxu0 %v794_v0 }
  0x6d   :  { %616 = vmatpush3.bf16.msra.mxu0 %v656_v34 }
  0x6e   :  { %617 = vmatprep.subr.bf16.mxu0 %v794_v0 }
  0x71   :  { %618 = vmatpush3.bf16.msra.mxu0 %v657_v35 }
 0x114   :  { %v199_v24 = vpop.f32.mrf.mxu0 }
 0x115   :  { %v200_v26 = vadd.f32 %v490_v23, %v199_v24 }
 0x116   :  { %v581_v25 = vpop.f32.mrf.mxu0 }
 0x117   :  { %v206_v30 = vmax.f32 %v200_v26, 0.0 }
 0x118   :  { %v202_v27 = vpop.f32.mrf.mxu0 }
 0x119   :  { %v203_v28 = vadd.f32 %v490_v23, %v202_v27 }
 0x11a   :  { %v582_v29 = vpop.f32.mrf.mxu0 }
 0x11b   :  { %v207_v31 = vmax.f32 %v203_v28, 0.0 }
 0x11d   :  { %v208_v32 = vpack.c.bf16 %v207_v31, %v206_v30 }
 0x11f   :  { %600 = vmatmul.mubr.bf16.vlgmr.msra.gmra.mxu1 %v208_v32 }
 0x1df   :  { %v314_v37 = vpop.f32.mrf.mxu1 }
 0x1e0   :  { %v315_v39 = vadd.f32 %v500_v36, %v314_v37 }
 0x1e1   :  { %v601_v38 = vpop.f32.mrf.mxu1 }
 0x1e2   :  { %v321_v43 = vmax.f32 %v315_v39, 0.0 }
 0x1e3   :  { %v317_v40 = vpop.f32.mrf.mxu1 }
 0x1e4   :  { %v318_v41 = vadd.f32 %v500_v36, %v317_v40 }
 0x1e5   :  { %v602_v42 = vpop.f32.mrf.mxu1 }
 0x1e6   :  { %v322_v44 = vmax.f32 %v318_v41, 0.0 }
 0x1e8   :  { %v323_v45 = vpack.c.bf16 %v322_v44, %v321_v43 }
 0x1ea   :  { %530 = vst [vmem:[#allocation10] sm:$0xff] %v323_v45   ;;  %620 = vmatmul.mubr.bf16.vlgmr.msra.gmra.mxu0 %v323_v45 }
 0x1eb   :  { %749 = shalt.err (!%p746_p10)
}
 0x1ec   :  { %466 = dma.vmem_to_hbm [thread:$0]  %s461_s27, 128, %s925_s7, [#allocation4], %s790_s10, %s790_s10, %s791_s11  }
 0x1ed   :  { %v509_v47 = vld [vmem:[%s924_s6] ss:$0 sm:$0xff]  ;;  %s797_s12 = smov [#allocation11]  }
 0x1ee   :  { %s472_s13 = sshll.u32 %s797_s12, 4  ;;  %s473_s13 = int_to_ptr.vmem [resolvable:$true] %s472_s13 }
 0x1ef   :  { %s758_s14 = scalar_lea.vmem %s473_s13, 128  ;;  %p763_p12 = scmp.lt.s32.totalorder %s473_s13, %s473_s13 }
 0x1f0   :  { %p759_p11 = scmp.ne.s32.totalorder %s473_s13, %s758_s14  ;;  %p764_p13 = scmp.lt.s32.totalorder %s758_s14, %s758_s14 }
 0x1f2   :  { %p765_p0 = por %p764_p13, %p763_p12 }
 0x1f4   :  { %p766_p1 = pnand %p765_p0, %p759_p11 }
 0x2aa   :  { %v429_v46 = vpop.f32.mrf.mxu0 }
 0x2ab   :  { %v430_v50 = vadd.f32 %v509_v47, %v429_v46 }
 0x2ac   :  { %v621_v48 = vpop.f32.mrf.mxu0 }
 0x2ae   :  { %v432_v49 = vpop.f32.mrf.mxu0 }
 0x2af   :  { %v433_v51 = vadd.f32 %v509_v47, %v432_v49 }
 0x2b0   :  { %v622_v52 = vpop.f32.mrf.mxu0 }
 0x2b1   :  { %v534_v53 = vpack.c.bf16 %v433_v51, %v430_v50 }
 0x2b3   :  { %535 = vst [vmem:[#allocation11] sm:$0xff] %v534_v53  }
 0x2b4   :  { %769 = shalt.err (!%p766_p1)
}
 0x2b5   :  { %478 = dma.vmem_to_hbm [thread:$0]  %s473_s13, 128, %s926_s8, [#allocation12], %s790_s10, %s790_s10, %s791_s11  }
 0x2b6   :  { %784 = dma.done.wait [#allocation4], 128  }
 0x2b7   :  { %785 = vsyncadd [#allocation4], 4294967168 }
 0x2b8   :  { %786 = dma.done.wait [#allocation12], 128  }
 0x2b9   :  { %787 = vsyncadd [#allocation12], 4294967168 }
 0x2ba   :  { %485 = vsyncpa [#allocation3], 1 }
 0x2bb   :  { %486 = vsyncpa [#allocation6], 1 }
 0x2bc   :  { %487 = vsyncpa [#allocation9], 1 }
 0x2bd   :  { %488 = vsyncpa [#allocation4], 1 }
 0x2be   :  { %489 = vsyncpa [#allocation12], 1 }

</bundles_post_ra>
